<compile_context>
chip_gen: v6e
topology: v6e:2x2x1
jax: 0.10.0
libtpu: 0.0.40
codegen_flags: <defaults>
</compile_context>

<pallas_src>
import numpy as np
import jax
import jax.numpy as jnp
from jax import lax
from jax.experimental import pallas as pl
from jax.experimental.pallas import tpu as pltpu


# ----------------------------------------------------------------------------- helpers
def _round_up(x: int, m: int) -> int:
    return ((x + m - 1) // m) * m


def _pick_voxel_tile(V: int, tn_target: int) -> int:
    """Largest lane-dense (multiple of 128) voxel tile <= tn_target minimizing V padding;
    ties prefer an even tile count (v7x megacore split), then larger tn."""
    v128 = _round_up(max(V, 1), 128)
    hi = max(128, min(tn_target, v128))
    best_key, best_tn = None, 128
    for tn in range(128, hi + 1, 128):
        vp = _round_up(V, tn)
        key = (vp - V, (vp // tn) % 2, -tn)   # padding bytes, odd-tile penalty, big tn
        if best_key is None or key < best_key:
            best_key, best_tn = key, tn
    return best_tn


# ----------------------------------------------------------------------------- geometry
def build_backprojection_tables_np(n_angles, n_det, vol_h, vol_w):
    """Sparse parallel-beam backprojection structure (float64 host math, no file I/O).

    For voxel (y, x) and angle theta: t = x*cos + y*sin + det_center.  The adjoint of a
    linearly-interpolated forward projector deposits (1 - frac) at bin i0 = floor(t) and
    frac at bin i0 + 1 (bins outside [0, n_det) contribute nothing).  Returns
        i0   [n_angles, V] int32   (unclamped; out-of-range handled structurally)
        frac [n_angles, V] float32
    i.e. exactly the 2 nonzeros per (angle, voxel) column of the dense operator W.
    """
    angles = np.arange(n_angles, dtype=np.float64) * (np.pi / n_angles)
    xs = np.arange(vol_w, dtype=np.float64) - (vol_w - 1) / 2.0
    ys = np.arange(vol_h, dtype=np.float64) - (vol_h - 1) / 2.0
    X, Y = np.meshgrid(xs, ys)
    det_center = (n_det - 1) / 2.0
    t = (np.cos(angles)[:, None] * X.reshape(-1)[None, :]
         + np.sin(angles)[:, None] * Y.reshape(-1)[None, :] + det_center)   # [A, V]
    i0 = np.floor(t)
    frac = (t - i0).astype(np.float32)
    return i0.astype(np.int32), frac


def build_backprojection_matrix_np(n_angles: int, n_det: int, vol_h: int, vol_w: int):
    """Dense backprojection matrix W [n_angles*n_det, vol_h*vol_w] (f32).

    Host-side, used ONLY as an independent correctness reference in __main__; the
    kernel never builds or streams this matrix.
    """
    angles = np.arange(n_angles, dtype=np.float64) * (np.pi / n_angles)
    xs = np.arange(vol_w, dtype=np.float64) - (vol_w - 1) / 2.0
    ys = np.arange(vol_h, dtype=np.float64) - (vol_h - 1) / 2.0
    X, Y = np.meshgrid(xs, ys)
    V = vol_h * vol_w
    P = n_angles * n_det
    W = np.zeros((P, V), dtype=np.float32)
    det_center = (n_det - 1) / 2.0
    cols = np.arange(V)
    for a, th in enumerate(angles):
        t = (X * np.cos(th) + Y * np.sin(th) + det_center).reshape(-1)
        i0 = np.floor(t).astype(np.int64)
        frac = t - i0
        for idx, w in ((i0, 1.0 - frac), (i0 + 1, frac)):
            valid = (idx >= 0) & (idx < n_det)
            rows = a * n_det + np.clip(idx, 0, n_det - 1)
            np.add.at(W, (rows[valid], cols[valid]), w[valid].astype(np.float32))
    return W


# ----------------------------------------------------------------------------- kernel
def _backproject_kernel(i0_ref, fr_ref, sino_ref, o_ref):
    # One (voxel-tile j, angle-tile k) grid step.
    #   i0_ref, fr_ref : [ta, tn]      interpolation tables for this angle/voxel tile
    #   sino_ref       : [Ap, Mp, Dp]  full sinogram, VMEM-resident (constant block idx)
    #   o_ref          : [Mp, tn] f32  output tile; in-place accumulator across axis 1
    k = pl.program_id(1)
    ta, tn = i0_ref.shape
    dp = sino_ref.shape[2]

    @pl.when(k == 0)
    def _():
        o_ref[...] = jnp.zeros_like(o_ref)

    # Hoisted out of the angle loop (loop-invariant).
    d_iota = lax.broadcasted_iota(jnp.int32, (dp, tn), 0)

    def angle_step(a, carry):
        i0 = i0_ref[pl.ds(a, 1), :]                       # [1, tn] int32 floor bin
        fr = fr_ref[pl.ds(a, 1), :]                       # [1, tn] f32 interp fraction
        # 2-sparse interpolation column of the operator as a weighted one-hot matrix.
        # (d == i0) and (d == i0+1) are mutually exclusive; out-of-range bins either
        # match no row or match a zero-padded sinogram row, contributing exactly 0.
        wa = jnp.where(d_iota == i0, 1.0 - fr,
                       jnp.where(d_iota == i0 + 1, fr, 0.0))       # [Dp, tn] f32
        s = sino_ref[k * ta + a]                                    # [Mp, Dp] f32
        o_ref[...] += jnp.dot(s, wa, preferred_element_type=jnp.float32)
        return carry

    lax.fori_loop(0, ta, angle_step, None)


def backproject(sino, i0, frac, *, tn: int, ta: int) -> jax.Array:
    """sino [Ap, Mp, Dp] f32, i0/frac [Ap, Vp] -> [Mp, Vp] f32 backprojection."""
    Ap, Mp, Dp = sino.shape
    Ap2, Vp = i0.shape
    assert Ap == Ap2 and Vp % tn == 0 and Ap % ta == 0
    grid = (Vp // tn, Ap // ta)          # voxel tiles (parallel), angle reduction last

    # Double-buffered table tiles + resident sinogram + resident f32 output tile.
    vmem_need = (2 * 2 * ta * tn * 4
                 + 2 * Ap * Mp * _round_up(Dp, 128) * 4
                 + 2 * Mp * tn * 4)
    try:   # generation-aware cap (v7x: 64 MiB physical VMEM; v5e/v6e: 128 MiB)
        vmem_cap = int(getattr(pltpu.get_tpu_info(), "vmem_capacity_bytes", 64 << 20))
    except Exception:
        vmem_cap = 64 << 20
    vmem_limit = int(min(max(2 * vmem_need + (8 << 20), 32 << 20),
                         max(vmem_cap - (8 << 20), vmem_need + (4 << 20))))

    cost = pl.CostEstimate(
        flops=2 * Mp * Dp * Vp * Ap + 4 * Dp * Vp * Ap,
        transcendentals=0,
        bytes_accessed=2 * Ap * Vp * 4 + Ap * Mp * Dp * 4 + Mp * Vp * 4,
    )

    return pl.pallas_call(
        _backproject_kernel,
        out_shape=jax.ShapeDtypeStruct((Mp, Vp), jnp.float32),
        grid_spec=pltpu.PrefetchScalarGridSpec(
            num_scalar_prefetch=0,
            grid=grid,
            in_specs=[
                pl.BlockSpec((ta, tn), lambda j, k: (k, j)),           # i0 tile
                pl.BlockSpec((ta, tn), lambda j, k: (k, j)),           # frac tile
                pl.BlockSpec((Ap, Mp, Dp), lambda j, k: (0, 0, 0)),    # resident sinogram
            ],
            out_specs=pl.BlockSpec((Mp, tn), lambda j, k: (0, j)),
        ),
        compiler_params=pltpu.CompilerParams(
            dimension_semantics=("parallel", "arbitrary"),
            vmem_limit_bytes=vmem_limit,
        ),
        cost_estimate=cost,
    )(i0, frac, sino)


# ----------------------------------------------------------------------------- model
class BackprojectorModelPallas:
    """forward(y): apply the fixed, deterministic backprojection operator to y."""

    def __init__(self, n_angles, n_det, vol_h, vol_w, *, tn_target=2048, ta_target=64):
        self.n_angles, self.n_det = n_angles, n_det
        self.vol_h, self.vol_w = vol_h, vol_w
        self.V = vol_h * vol_w

        i0, frac = build_backprojection_tables_np(n_angles, n_det, vol_h, vol_w)

        # Tile selection: lane-dense voxel tiles with minimal V padding and (ties) an
        # even tile count for v7x's 2 TensorCores; angle tiles are multiples of 8.
        self.tn = _pick_voxel_tile(self.V, tn_target)
        self.Vp = _round_up(self.V, self.tn)
        self.ta = min(ta_target, _round_up(n_angles, 8))
        self.Ap = _round_up(n_angles, self.ta)
        self.Dp = _round_up(n_det, 8)

        # Padded (angle, voxel) table entries use an impossible bin index so they match
        # no detector row and contribute exactly zero.
        i0p = np.full((self.Ap, self.Vp), -(1 << 20), dtype=np.int32)
        frp = np.zeros((self.Ap, self.Vp), dtype=np.float32)
        i0p[:n_angles, : self.V] = i0
        frp[:n_angles, : self.V] = frac
        self.i0 = jnp.asarray(i0p)
        self.frac = jnp.asarray(frp)

    def __call__(self, y: jax.Array) -> jax.Array:
        # y: [B, C, n_angles, n_det]  ->  vol: [B, C, vol_h, vol_w]
        B, C, A, D = y.shape
        assert (A, D) == (self.n_angles, self.n_det)
        M = B * C
        Mp = _round_up(M, 8)
        # Sinogram laid out [angles, batch, detectors], zero-padded, kept in f32.
        sino = jnp.transpose(y.reshape(M, A, D).astype(jnp.float32), (1, 0, 2))
        sino = jnp.pad(sino, ((0, self.Ap - A), (0, Mp - M), (0, self.Dp - D)))
        vol = backproject(sino, self.i0, self.frac, tn=self.tn, ta=self.ta)
        return vol[:M, : self.V].reshape(B, C, self.vol_h, self.vol_w)


# ----------------------------------------------------------------------------- main
if __name__ == "__main__":
    # Small deterministic problem that still exercises multiple voxel tiles, detector
    # boundary clipping, and batch/detector padding: 32 angles x 64 bins -> 48x48 volume.
    B, C, N_ANGLES, N_DET = 2, 1, 32, 64
    VOL_H, VOL_W = 48, 48

    model = BackprojectorModelPallas(N_ANGLES, N_DET, VOL_H, VOL_W)

    key = jax.random.PRNGKey(0)
    y = jax.random.normal(key, (B, C, N_ANGLES, N_DET), dtype=jnp.float32)

    vol = jax.block_until_ready(model(y))
    assert vol.shape == (B, C, VOL_H, VOL_W)

    # Independent dense reference (host-only, float64): backprojection is y_flat @ W.
    W_np = build_backprojection_matrix_np(N_ANGLES, N_DET, VOL_H, VOL_W)
    y_np = np.asarray(y, dtype=np.float64).reshape(B * C, -1)
    ref = (y_np @ W_np.astype(np.float64)).reshape(B, C, VOL_H, VOL_W)
    np.testing.assert_allclose(np.asarray(vol), ref, rtol=2e-2, atol=1e-1)

    print("KERNEL_OK")
</pallas_src>

<mosaic_0001>
module attributes {stable_mosaic.version = 11 : i64} {
  func.func @_backproject_kernel(%arg0: i32, %arg1: i32, %arg2: memref<32x1152xi32, #tpu.memory_space<vmem>>, %arg3: memref<32x1152xf32, #tpu.memory_space<vmem>>, %arg4: memref<32x8x64xf32, #tpu.memory_space<vmem>>, %arg5: memref<8x1152xf32, #tpu.memory_space<vmem>>) attributes {dimension_semantics = [#tpu.dimension_semantics<parallel>, #tpu.dimension_semantics<arbitrary>], iteration_bounds = array<i64: 2, 1>, scalar_prefetch = 0 : i64, scratch_operands = 0 : i64, tpu.core_type = #tpu.core_type<tc>, window_params = [{transform_indices = @transform_0, window_bounds = array<i64: 32, 1152>}, {transform_indices = @transform_1, window_bounds = array<i64: 32, 1152>}, {pipeline_mode = #tpu.pipeline_mode<synchronous>, transform_indices = @transform_2, window_bounds = array<i64: 32, 8, 64>}, {transform_indices = @transform_3, window_bounds = array<i64: 8, 1152>}]} {
    %c0_i32 = arith.constant 0 : i32
    %0 = arith.cmpi eq, %arg1, %c0_i32 : i32
    %1 = arith.extui %0 : i1 to i32
    %c0_i32_0 = arith.constant 0 : i32
    %2 = arith.cmpi ne, %1, %c0_i32_0 : i32
    scf.if %2 {
      %cst = arith.constant 0.000000e+00 : f32
      %5 = vector.broadcast %cst : f32 to vector<8x1152xf32>
      %c0 = arith.constant 0 : index
      %c0_3 = arith.constant 0 : index
      %6 = vector.load %arg5[%c0, %c0_3] : memref<8x1152xf32, #tpu.memory_space<vmem>>, vector<8x1152xf32>
      tpu.vector_store %arg5[%c0, %c0_3], %5 {strides = array<i32>} : memref<8x1152xf32, #tpu.memory_space<vmem>>, vector<8x1152xf32>,
    } else {
    }
    %3 = tpu.iota {dimensions = array<i32: 0>} : vector<64x1152xi32>
    %c0_i32_1 = arith.constant 0 : i32
    %c32_i32 = arith.constant 32 : i32
    %4 = arith.addi %c0_i32_1, %c32_i32 : i32
    %c1_i32 = arith.constant 1 : i32
    scf.for %arg6 = %c0_i32_1 to %4 step %c1_i32  : i32 {
      %5 = arith.index_cast %arg6 : i32 to index
      %c0 = arith.constant 0 : index
      %6 = vector.load %arg2[%5, %c0] : memref<32x1152xi32, #tpu.memory_space<vmem>>, vector<1x1152xi32>
      %7 = arith.index_cast %arg6 : i32 to index
      %c0_3 = arith.constant 0 : index
      %8 = vector.load %arg3[%7, %c0_3] : memref<32x1152xf32, #tpu.memory_space<vmem>>, vector<1x1152xf32>
      %9 = vector.broadcast %6 : vector<1x1152xi32> to vector<64x1152xi32>
      %10 = arith.cmpi eq, %3, %9 : vector<64x1152xi32>
      %cst = arith.constant 1.000000e+00 : f32
      %11 = vector.broadcast %cst : f32 to vector<1x1152xf32>
      %12 = arith.subf %11, %8 : vector<1x1152xf32>
      %c1_i32_4 = arith.constant 1 : i32
      %13 = vector.broadcast %c1_i32_4 : i32 to vector<1x1152xi32>
      %14 = arith.addi %6, %13 : vector<1x1152xi32>
      %15 = vector.broadcast %14 : vector<1x1152xi32> to vector<64x1152xi32>
      %16 = arith.cmpi eq, %3, %15 : vector<64x1152xi32>
      %cst_5 = arith.constant 0.000000e+00 : f32
      %17 = vector.shape_cast %8 : vector<1x1152xf32> to vector<1x1152xf32>
      %18 = vector.broadcast %17 : vector<1x1152xf32> to vector<64x1152xf32>
      %19 = vector.broadcast %cst_5 : f32 to vector<64x1152xf32>
      %20 = arith.select %16, %18, %19 : vector<64x1152xi1>, vector<64x1152xf32>
      %21 = vector.shape_cast %12 : vector<1x1152xf32> to vector<1x1152xf32>
      %22 = vector.broadcast %21 : vector<1x1152xf32> to vector<64x1152xf32>
      %23 = arith.select %10, %22, %20 : vector<64x1152xi1>, vector<64x1152xf32>
      %c32_i32_6 = arith.constant 32 : i32
      %24 = arith.muli %arg1, %c32_i32_6 : i32
      %25 = arith.addi %24, %arg6 : i32
      %26 = arith.index_cast %25 : i32 to index
      %c0_7 = arith.constant 0 : index
      %c0_8 = arith.constant 0 : index
      %27 = vector.load %arg4[%26, %c0_7, %c0_8] : memref<32x8x64xf32, #tpu.memory_space<vmem>>, vector<1x8x64xf32>
      %28 = vector.shape_cast %27 : vector<1x8x64xf32> to vector<8x64xf32>
      %c0_9 = arith.constant 0 : index
      %c0_10 = arith.constant 0 : index
      %29 = vector.load %arg5[%c0_9, %c0_10] : memref<8x1152xf32, #tpu.memory_space<vmem>>, vector<8x1152xf32>
      %cst_11 = arith.constant dense<0.000000e+00> : vector<8x1152xf32>
      %30 = tpu.matmul %28, %23, %cst_11 {dimension_numbers = #tpu.dot_dimension_numbers<[1], [0], [0], [1], [0, 0, 1, 1], [], []>} : vector<8x64xf32>, vector<64x1152xf32>, vector<8x1152xf32> -> vector<8x1152xf32>
      %31 = arith.addf %29, %30 : vector<8x1152xf32>
      %c0_12 = arith.constant 0 : index
      %c0_13 = arith.constant 0 : index
      %32 = vector.load %arg5[%c0_12, %c0_13] : memref<8x1152xf32, #tpu.memory_space<vmem>>, vector<8x1152xf32>
      tpu.vector_store %arg5[%c0_12, %c0_13], %31 {strides = array<i32>} : memref<8x1152xf32, #tpu.memory_space<vmem>>, vector<8x1152xf32>,
    }
    %c32_i32_2 = arith.constant 32 : i32
    return
  }
  func.func @transform_0(%arg0: i32, %arg1: i32) -> (i32, i32) {
    %c0_i32 = arith.constant 0 : i32
    return %arg1, %arg0 : i32, i32
  }
  func.func @transform_1(%arg0: i32, %arg1: i32) -> (i32, i32) {
    %c0_i32 = arith.constant 0 : i32
    return %arg1, %arg0 : i32, i32
  }
  func.func @transform_2(%arg0: i32, %arg1: i32) -> (i32, i32, i32) {
    %c0_i32 = arith.constant 0 : i32
    %c0_i32_0 = arith.constant 0 : i32
    %c0_i32_1 = arith.constant 0 : i32
    %c0_i32_2 = arith.constant 0 : i32
    return %c0_i32, %c0_i32_0, %c0_i32_1 : i32, i32, i32
  }
  func.func @transform_3(%arg0: i32, %arg1: i32) -> (i32, i32) {
    %c0_i32 = arith.constant 0 : i32
    %c0_i32_0 = arith.constant 0 : i32
    return %c0_i32, %arg0 : i32, i32
  }
}

</mosaic_0001>

<bundles_post_ra>
// kernel: tpu_custom_call.1
= control target key start
LH: loop header
LB: loop body
LE: loop exit
PB: predicated region body
PF: predicated region fallthrough
CT: control target
= control target key end

     0   :  { %s2610_s0 = inlined_call_operand.hbm [shape: s32[32,2304], index: 0, kind: input, shape index: {}]   ;;  %s2611_s1 = inlined_call_operand.hbm [shape: f32[32,2304], index: 1, kind: input, shape index: {}]   ;;  %s2612_s2 = inlined_call_operand.hbm [shape: f32[32,8,64], index: 2, kind: input, shape index: {}]   ;;  %s2613_s3 = inlined_call_operand.hbm [shape: f32[8,2304], index: 3, kind: output, shape index: {}]  }
   0x1   :  { %2619 = sst [smem:[#allocation16_spill]] %s2610_s0 }
   0x2   :  { %2620 = sst [smem:[#allocation17_spill]] %s2612_s2 }
   0x3   :  { %8 = vsyncpa [#allocation3], 0 }
   0x4   :  { %10 = vsyncpa [#allocation3 + $0x1], 0 }
   0x5   :  { %11 = vsyncpa [#allocation6], 0 }
   0x6   :  { %13 = vsyncpa [#allocation6 + $0x1], 0 }
   0x7   :  { %14 = vsyncpa [#allocation4], 0 }
   0x8   :  { %16 = vsyncpa [#allocation4 + $0x1], 0  ;;  %s1688_s12 = smov 0   ;;  %s1690_s13 = smov 0  }
   0x9   :  { %s1692_s14 = smov 0   ;;  %s1694_s15 = smov 0  }
   0xa   :  { %s1696_s16 = smov 0   ;;  %s1698_s17 = smov 0  }
   0xb LB: > { %2621 = sst [smem:[#allocation13_spill]] %s1638_s14  ;;  %s1719_s18 = sadd.s32 4294967295, %s1650_s17   ;;  %s1650_s17 = sphi %s1698_s17, %s22_s17   ;;  %s1646_s16 = sphi %s1696_s16, %s2647_s16   ;;  %s1642_s15 = sphi %s1694_s15, %s2646_s15   ;;  %s1638_s14 = sphi %s1692_s14, %s2642_s14   ;;  %s1634_s13 = sphi %s1690_s13, %s2645_s13   ;;  %s1630_s12 = sphi %s1688_s12, %s2644_s12  }
   0xc   : > { %s1325_s19 = sadd.s32 4294967294, %s1650_s17   ;;  %p50_p0 = scmp.ne.s32.totalorder %s1638_s14, %s1634_s13 }
   0xd   : > { %p51_p1 = scmp.eq.s32.totalorder %s1650_s17, 0  ;;  %p56_p2 = scmp.ne.s32.totalorder %s1634_s13, %s1630_s12 }
   0xe   : > { %p2614_p3 = scmp.eq.s32.totalorder %s1719_s18, 0  ;;  %p129_p4 = scmp.eq.s32.totalorder %s1719_s18, 1 }
   0xf   : > { %p1730_p5 = por %p51_p1, %p50_p0  ;;  %p135_p6 = scmp.eq.s32.totalorder %s1325_s19, 1 }
  0x10   : > { %p1736_p7 = por %p2614_p3, %p56_p2  ;;  %p1740_p8 = por %p129_p4, %p50_p0 }
  0x11   : > { %p1744_p9 = por %p135_p6, %p56_p2  ;;  %p1326_p10 = scmp.ge.s32.totalorder %s1650_s17, 1 }
  0x12   : > { %s2623_s22 = scalar_select %p1736_p7, 1, 0 }
  0x13   : > { %s2624_s23 = scalar_select %p1740_p8, 1, 0 }
  0x14   : > { %s2625_s24 = scalar_select %p1744_p9, 1, 0 }
  0x15   : > { %p142_p11 = scmp.lt.s32.totalorder %s1650_s17, 3  ;;  %s1656_s26 = smov [#allocation7]  }
  0x16   : > { %s154_s27 = sshll.u32 %s1656_s26, 4  ;;  %p1408_p1 = scmp.lt.s32.totalorder %s1650_s17, 2  ;;  %s155_s27 = int_to_ptr.vmem [resolvable:$true] %s154_s27 }
  0x17   : > { %p1750_p12 = pnand %p1326_p10, %p142_p11  ;;  %s34_s30 = sadd.s32 1, %s1646_s16 }
  0x18   : > { %p1766_p2 = pnand %p1408_p1, %p1730_p5  ;;  %p1771_p6 = scmp.ge.s32.totalorder %s34_s30, 2 }
  0x19   : > { %p1392_p13 = pneg %p1750_p12  ;;  %s1487_s5 = scalar_lea.vmem %s155_s27, 4096 }
  0x1a   : > { %p1488_p11 = scmp.ne.s32.totalorder %s155_s27, %s1487_s5  ;;  %p1496_p9 = scmp.lt.s32.totalorder %s1487_s5, %s1487_s5 }
  0x1b   : > { %p1760_p4 = pnand %p1392_p13, %p2614_p3  ;;  %p1495_p3 = scmp.lt.s32.totalorder %s155_s27, %s155_s27 }
  0x1d   : > { %p1478_p10 = pneg %p1760_p4  ;;  %p1497_p8 = por %p1496_p9, %p1495_p3 }
  0x1f   : > { %p1490_p0 = pnand %p1488_p11, %p1478_p10 }
  0x21   : > { %p1491_p13 = pneg %p1490_p0 }
  0x23   : > { %p1498_p7 = pnand %p1497_p8, %p1491_p13 }
  0x25   : > { %1501 = shalt.err (!%p1498_p7)
}
  0x26   : > { %s1657_s6 = smov 128   ;;  %s1658_s7 = smov 8  }
  0x27   : > { %s2630_s2 = sld [smem:[#allocation17_spill]]  ;;  %s168_s10 = sand.u32 1, %s1638_s14  }
  0x28   : > { %s2649_s30 = smov (%p1771_p6, %s34_s30), 0  ;;  %s1787_s11 = smul.u32 288, %s168_s10 }
  0x29   : > { %2631 = sst [smem:[#allocation14_spill]] %s2649_s30  ;;  %s39_s19 = ssub.s32 %s1646_s16, %s2649_s30 }
  0x2a   : > { %s1347_s21 = smul.u32 1152, %s1646_s16  ;;  %p41_p3 = scmp.eq.s32.totalorder %s39_s19, 0 }
  0x2b   : > { %s2632_s0 = sld [smem:[#allocation16_spill]]  ;;  %s172_s20 = scalar_lea.vmem [#allocation2], %s1787_s11 }
  0x2c   : > { %s182_s8 = sshll.u32 %s172_s20, 4  ;;  %s169_s4 = scalar_lea.sflag [#allocation3], %s168_s10  ;;  %s183_s8 = int_to_ptr.vmem [resolvable:$true] %s182_s8 }
  0x2d   : > { %1395 = dma.hbm_to_vmem [thread:$0]  (!%p1760_p4), %s2630_s2, 4096, %s155_s27, [#allocation6], %s1657_s6, %s1657_s6, %s1658_s7  }
  0x2e   : > { %s2633_s27 = sadd.s32 1, %s1638_s14  ;;  %p1504_p5 = pneg %p1766_p2 }
  0x2f   : > { %s1801_s6 = scalar_select %p41_p3, %s1638_s14, %s2633_s27  }
  0x30   : > { %s1515_s7 = scalar_lea.vmem %s183_s8, 4608  ;;  %s1659_s9 = smov [#allocation2]  }
  0x31   : > { %s181_s28 = scalar_lea.hbm %s2632_s0, %s1347_s21  ;;  %2634 = sst [smem:[#allocation15_spill]] %s1801_s6 }
  0x32   : > { %p1516_p7 = scmp.ne.s32.totalorder %s183_s8, %s1515_s7  ;;  %s1520_s19 = sshll.u32 %s1659_s9, 4  ;;  %s1521_s19 = int_to_ptr.vmem [resolvable:$false] %s1520_s19 }
  0x33   : > { %s1522_s26 = scalar_lea.vmem %s1521_s19, 9216  ;;  %p1523_p0 = scmp.lt.s32.totalorder %s183_s8, %s1521_s19 }
  0x34   : > { %p1518_p8 = pnand %p1516_p7, %p1504_p5  ;;  %p1524_p1 = scmp.lt.s32.totalorder %s1522_s26, %s1515_s7 }
  0x36   : > { %p1519_p9 = pneg %p1518_p8  ;;  %p1525_p4 = por %p1524_p1, %p1523_p0 }
  0x38   : > { %p1526_p6 = pnand %p1525_p4, %p1519_p9 }
  0x3a   : > { %1529 = shalt.err (!%p1526_p6)
}
  0x3b   : > { %s1660_s20 = smov 2304   ;;  %s1661_s10 = smov 1152  }
  0x3c   : > { %s1662_s5 = smov 72   ;;  %s192_s27 = sand.u32 1, %s1650_s17  }
  0x3d   : > { %1399 = dma.hbm_to_vmem [thread:$0]  (!%p1766_p2), %s181_s28, 4608, %s183_s8, %s169_s4, %s1660_s20, %s1661_s10, %s1662_s5  }
  0x3e   : > { %s205_s19 = scalar_lea.hbm %s2611_s1, %s1347_s21  ;;  %s196_s7 = scalar_lea.vmem [#allocation5], %s1787_s11 }
  0x3f   : > { %s206_s26 = sshll.u32 %s196_s7, 4  ;;  %s193_s2 = scalar_lea.sflag [#allocation6], %s192_s27  ;;  %s207_s26 = int_to_ptr.vmem [resolvable:$true] %s206_s26 }
  0x40   : > { %s1543_s30 = scalar_lea.vmem %s207_s26, 4608  ;;  %s1663_s6 = smov [#allocation5]  }
  0x41   : > { %p1544_p10 = scmp.ne.s32.totalorder %s207_s26, %s1543_s30  ;;  %s1548_s14 = sshll.u32 %s1663_s6, 4  ;;  %s1549_s14 = int_to_ptr.vmem [resolvable:$false] %s1548_s14 }
  0x42   : > { %s1550_s28 = scalar_lea.vmem %s1549_s14, 9216  ;;  %p1551_p3 = scmp.lt.s32.totalorder %s207_s26, %s1549_s14 }
  0x43   : > { %p1546_p11 = pnand %p1544_p10, %p1504_p5  ;;  %p1552_p7 = scmp.lt.s32.totalorder %s1550_s28, %s1543_s30 }
  0x45   : > { %p1547_p13 = pneg %p1546_p11  ;;  %p1553_p8 = por %p1552_p7, %p1551_p3 }
  0x47   : > { %p1554_p9 = pnand %p1553_p8, %p1547_p13 }
  0x49   : > { %1557 = shalt.err (!%p1554_p9)
}
  0x4a   : > { %1402 = dma.hbm_to_vmem [thread:$0]  (!%p1766_p2), %s205_s19, 4608, %s207_s26, %s193_s2, %s1660_s20, %s1661_s10, %s1662_s5  }
  0x4b   : > { %218 = sbr.rel (%p1750_p12) target bundleno = 400 (0x190), region = 32  ;;  %s1825_s0 = sand.u32 (!%p1750_p12), 1, %s1634_s13  }
  0x4c   : > { %s1380_s11 = smul.u32 (!%p1750_p12), 288, %s1825_s0  ;;  %s221_s21 = scalar_lea.sflag (!%p1750_p12), [#allocation3], %s1825_s0 }
  0x4d   : > { %p2635_p5 = scmp.ne.s32.totalorder (!%p1750_p12), %s2623_s22, 0 }
  0x4e   : > { %s1829_s8 = scalar_lea.vmem (!%p1750_p12), [#allocation2], %s1380_s11 }
  0x50   : > { %1613 = dma.done.wait (%p2635_p5), %s221_s21, 4608  }
  0x51   : > { %1615 = vsyncadd (%p2635_p5), %s221_s21, 4294962688  ;;  %s229_s2 = sand.u32 1, %s1719_s18   ;;  %s1836_s25 = scalar_lea.vmem [#allocation5], %s1380_s11 }
  0x52   : > { %s230_s14 = scalar_lea.sflag [#allocation6], %s229_s2 }
  0x53   : > { %1617 = dma.done.wait (%p2635_p5), %s230_s14, 4608  }
  0x54   : > { %1619 = vsyncadd (%p2635_p5), %s230_s14, 4294962688  ;;  %p2636_p12 = scmp.eq.s32.totalorder %s1719_s18, 0 }
  0x56   : > { %1621 = dma.done.wait (%p2636_p12), [#allocation6], 4096   ;;  %p2637_p2 = pmov %p2636_p12 }
  0x57   : > { %s1381_s29 = smul.u32 72, %s1825_s0  ;;  %v283_v0 = vlaneseq  ;;  %v1664_v2 = vmov 0.0   ;;  %s1881_s18 = smov 0  }
  0x58   : > { %1623 = vsyncadd (%p2637_p2), [#allocation6], 4294963200 }
  0x59   : > { %v1847_v1 = vshrl.u32 %v283_v0, 7  ;;  %s1849_s30 = scalar_lea.vmem [#allocation8], %s1381_s29 }
  0x5a   : > { %274 = vst [vmem:[%s1849_s30] sm:$0xff] %v1664_v2  ;;  %275 = vst [vmem:[%s1849_s30 + $0x8] sm:$0xff] %v1664_v2 }
  0x5b   : > { %276 = vst [vmem:[%s1849_s30 + $0x10] sm:$0xff] %v1664_v2  ;;  %277 = vst [vmem:[%s1849_s30 + $0x18] sm:$0xff] %v1664_v2  ;;  %v1861_v3 = vadd.s32 8, %v1847_v1  ;;  %v1864_v4 = vadd.s32 16, %v1847_v1  ;;  %v1867_v5 = vadd.s32 24, %v1847_v1  ;;  %v1870_v6 = vadd.s32 32, %v1847_v1 }
  0x5c   : > { %278 = vst [vmem:[%s1849_s30 + $0x20] sm:$0xff] %v1664_v2  ;;  %279 = vst [vmem:[%s1849_s30 + $0x28] sm:$0xff] %v1664_v2  ;;  %v1873_v7 = vadd.s32 40, %v1847_v1  ;;  %v1876_v8 = vadd.s32 48, %v1847_v1  ;;  %v1879_v9 = vadd.s32 56, %v1847_v1 }
  0x5d   : > { %280 = vst [vmem:[%s1849_s30 + $0x30] sm:$0xff] %v1664_v2  ;;  %281 = vst [vmem:[%s1849_s30 + $0x38] sm:$0xff] %v1664_v2 }
  0x5e   : > { %282 = vst [vmem:[%s1849_s30 + $0x40] sm:$0xff] %v1664_v2 }
  0x5f LB: >> { %s298_s22 = sshra.s32 %s1654_s18, 3  ;;  %s301_s6 = sand.u32 7, %s1654_s18  ;;  %v1665_v10 = vmov 0.0   ;;  %v326_v11 = vsub.s32 1, %v1847_v1  ;;  %v1898_v12 = vsub.s32 0, %v1847_v1  ;;  %v1901_v13 = vsub.s32 3, %v1847_v1  ;;  %s1654_s18 = sphi %s1881_s18, %s297_s18  }
  0x60   : >> { %860 = vmatprep.mubr.f32.mxu0 %v1665_v10  ;;  %931 = vmatprep.mubr.f32.mxu1 %v1665_v10  ;;  %s1333_s4 = smul.u32 72, %s298_s22  ;;  %v1904_v14 = vsub.s32 2, %v1847_v1  ;;  %v1915_v21 = vsub.s32 5, %v1847_v1  ;;  %v1918_v22 = vsub.s32 4, %v1847_v1  ;;  %v1921_v23 = vsub.s32 7, %v1847_v1  ;;  %s1338_s27 = sshll.u32 %s1654_s18, 3 }
  0x61   : >> { %s781_s9 = scalar_lea.vmem [#allocation7], %s1338_s27  ;;  %s297_s18 = sadd.s32 1, %s1654_s18  }
  0x62   : >> { %s304_s20 = sadd.s32 %s1333_s4, %s301_s6  ;;  %p294_p0 = scmp.ge.s32.totalorder %s297_s18, 32  }
  0x63   : >> { %s1891_s10 = scalar_lea.vmem %s1829_s8, %s304_s20 [#allocation2]  ;;  %s1894_s5 = scalar_lea.vmem %s1836_s25, %s304_s20 [#allocation5] }
  0x64   : >> { %v306_v15 = vld [vmem:[%s1891_s10] ss:$8 sm:$0xf]  ;;  %s1349_s19 = smul.u32 (%p294_p0), 1152, %s1642_s15  ;;  %s1183_s7 = sshll.u32 (%p294_p0), %s1849_s30, 4  ;;  %s1184_s7 = int_to_ptr.vmem [resolvable:$true] %s1183_s7 }
  0x65   : >> { %v307_v16 = vld [vmem:[%s1891_s10] ss:$8 sm:$0xf0]  ;;  %s1169_s21 = scalar_lea.sflag (%p294_p0), [#allocation4], %s1825_s0  ;;  %s1558_s2 = scalar_lea.vmem (%p294_p0), %s1184_s7, 1152 }
  0x66   : >> { %v1908_v17 = vor.u32 %v307_v16, %v306_v15  ;;  %v315_v18 = vld [vmem:[%s1894_s5] ss:$8 sm:$0xf]  ;;  %s1181_s11 = scalar_lea.hbm (%p294_p0), %s2613_s3, %s1349_s19  ;;  %p1559_p1 = scmp.ne.s32.totalorder (%p294_p0), %s1184_s7, %s1558_s2 }
  0x67   : >> { %v316_v19 = vld [vmem:[%s1894_s5] ss:$8 sm:$0xf0]  ;;  %p2638_p4 = scmp.ne.s32.totalorder (%p294_p0), %s2624_s23, 0  ;;  %s1667_s14 = smov (%p294_p0), [#allocation8]  }
  0x68   : >> { %v1912_v20 = vor.u32 %v316_v19, %v315_v18  ;;  %v1924_v24 = vrot.slane %v1908_v17, %v326_v11  ;;  %v1927_v25 = vadd.s32 1, %v1908_v17  ;;  %v1931_v26 = vrot.slane %v1908_v17, %v1898_v12  ;;  %s1562_s29 = sshll.u32 (%p294_p0), %s1667_s14, 4  ;;  %s1563_s29 = int_to_ptr.vmem [resolvable:$false] %s1562_s29 }
  0x69   : >> { %v1935_v27 = vrot.slane %v1908_v17, %v1901_v13  ;;  %v2062_v0 = vrot.slane %v1908_v17, %v1904_v14  ;;  %p1560_p6 = pnand (%p294_p0), %p1559_p1, %p2638_p4  ;;  %s1564_s8 = scalar_lea.vmem (%p294_p0), %s1563_s29, 2304 }
  0x6a   : >> { %v1938_v28 = vsub.f32 1.0, %v1912_v20  ;;  %v1941_v29 = vrot.slane %v1912_v20, %v326_v11  ;;  %v1945_v30 = vrot.slane %v1912_v20, %v1898_v12  ;;  %v1949_v31 = vrot.slane %v1912_v20, %v1901_v13  ;;  %p1565_p11 = scmp.lt.s32.totalorder (%p294_p0), %s1184_s7, %s1563_s29  ;;  %p1566_p13 = scmp.lt.s32.totalorder (%p294_p0), %s1564_s8, %s1558_s2 }
  0x6b   : >> { %vm420_vm0 = vcmp.eq.s32.totalorder %v1879_v9, %v1924_v24  ;;  %v1954_v32 = vrot.slane %v1927_v25, %v326_v11  ;;  %vm419_vm1 = vcmp.eq.s32.totalorder %v1879_v9, %v1931_v26  ;;  %v1960_v33 = vrot.slane %v1927_v25, %v1898_v12  ;;  %p1561_p10 = pneg (%p294_p0), %p1560_p6 }
  0x6c   : >> { %v1963_v34 = vrot.slane %v1938_v28, %v326_v11  ;;  %v1967_v35 = vrot.slane %v1938_v28, %v1898_v12  ;;  %vm411_vm2 = vcmp.eq.s32.totalorder %v1876_v8, %v1924_v24  ;;  %vm410_vm3 = vcmp.eq.s32.totalorder %v1876_v8, %v1931_v26  ;;  %p1567_p3 = por (%p294_p0), %p1566_p13, %p1565_p11 }
  0x6d   : >> { %vm532_vm4 = vcmp.eq.s32.totalorder %v1879_v9, %v1954_v32  ;;  %vm531_vm5 = vcmp.eq.s32.totalorder %v1879_v9, %v1960_v33  ;;  %vm523_vm6 = vcmp.eq.s32.totalorder %v1876_v8, %v1954_v32  ;;  %vm522_vm7 = vcmp.eq.s32.totalorder %v1876_v8, %v1960_v33 }
  0x6e   : >> { %v651_v36 = vsel %vm532_vm4, %v1941_v29, 0.0  ;;  %v650_v37 = vsel %vm531_vm5, %v1945_v30, 0.0  ;;  %v642_v38 = vsel %vm523_vm6, %v1941_v29, 0.0  ;;  %v641_v39 = vsel %vm522_vm7, %v1945_v30, 0.0  ;;  %p1568_p7 = pnand (%p294_p0), %p1567_p3, %p1561_p10 }
  0x6f   : >> { %v770_v40 = vsel %vm420_vm0, %v1963_v34, %v651_v36  ;;  %v769_v41 = vsel %vm419_vm1, %v1967_v35, %v650_v37  ;;  %v761_v42 = vsel %vm411_vm2, %v1963_v34, %v642_v38  ;;  %v760_v43 = vsel %vm410_vm3, %v1967_v35, %v641_v39 }
  0x70   : >> { %812 = vmatprep.subr.mxu0 %v770_v40  ;;  %vm402_vm8 = vcmp.eq.s32.totalorder %v1873_v7, %v1924_v24  ;;  %vm514_vm9 = vcmp.eq.s32.totalorder %v1873_v7, %v1954_v32  ;;  %vm401_vm10 = vcmp.eq.s32.totalorder %v1873_v7, %v1931_v26  ;;  %vm513_vm11 = vcmp.eq.s32.totalorder %v1873_v7, %v1960_v33 }
  0x71   : >> { %813 = vmatpush1.msra.mxu0 %v769_v41  ;;  %v633_v44 = vsel %vm514_vm9, %v1941_v29, 0.0  ;;  %v632_v45 = vsel %vm513_vm11, %v1945_v30, 0.0  ;;  %vm393_vm12 = vcmp.eq.s32.totalorder %v1870_v6, %v1924_v24  ;;  %vm505_vm13 = vcmp.eq.s32.totalorder %v1870_v6, %v1954_v32 }
  0x72   : >> { %814 = vmatprep.subr.mxu0 %v761_v42  ;;  %v752_v46 = vsel %vm402_vm8, %v1963_v34, %v633_v44  ;;  %v751_v47 = vsel %vm401_vm10, %v1967_v35, %v632_v45  ;;  %v624_v48 = vsel %vm505_vm13, %v1941_v29, 0.0  ;;  %vm392_vm14 = vcmp.eq.s32.totalorder %v1870_v6, %v1931_v26 }
  0x73   : >> { %815 = vmatpush1.msra.mxu0 %v760_v43  ;;  %v743_v49 = vsel %vm393_vm12, %v1963_v34, %v624_v48  ;;  %vm504_vm15 = vcmp.eq.s32.totalorder %v1870_v6, %v1960_v33  ;;  %vm384_vm0 = vcmp.eq.s32.totalorder %v1867_v5, %v1924_v24  ;;  %vm496_vm1 = vcmp.eq.s32.totalorder %v1867_v5, %v1954_v32 }
  0x74   : >> { %816 = vmatprep.subr.mxu0 %v752_v46  ;;  %v623_v50 = vsel %vm504_vm15, %v1945_v30, 0.0  ;;  %v615_v51 = vsel %vm496_vm1, %v1941_v29, 0.0  ;;  %vm383_vm2 = vcmp.eq.s32.totalorder %v1867_v5, %v1931_v26  ;;  %vm495_vm3 = vcmp.eq.s32.totalorder %v1867_v5, %v1960_v33 }
  0x75   : >> { %817 = vmatpush1.msra.mxu0 %v751_v47  ;;  %v742_v52 = vsel %vm392_vm14, %v1967_v35, %v623_v50  ;;  %v734_v53 = vsel %vm384_vm0, %v1963_v34, %v615_v51  ;;  %v614_v54 = vsel %vm495_vm3, %v1945_v30, 0.0  ;;  %vm375_vm4 = vcmp.eq.s32.totalorder %v1864_v4, %v1924_v24 }
  0x76   : >> { %818 = vmatprep.subr.mxu0 %v743_v49  ;;  %v733_v55 = vsel %vm383_vm2, %v1967_v35, %v614_v54  ;;  %vm487_vm5 = vcmp.eq.s32.totalorder %v1864_v4, %v1954_v32  ;;  %vm374_vm6 = vcmp.eq.s32.totalorder %v1864_v4, %v1931_v26  ;;  %vm486_vm7 = vcmp.eq.s32.totalorder %v1864_v4, %v1960_v33 }
  0x77   : >> { %819 = vmatpush1.msra.mxu0 %v742_v52  ;;  %v606_v56 = vsel %vm487_vm5, %v1941_v29, 0.0  ;;  %v605_v57 = vsel %vm486_vm7, %v1945_v30, 0.0  ;;  %vm366_vm8 = vcmp.eq.s32.totalorder %v1861_v3, %v1924_v24  ;;  %vm478_vm9 = vcmp.eq.s32.totalorder %v1861_v3, %v1954_v32 }
  0x78   : >> { %820 = vmatprep.subr.mxu0 %v734_v53  ;;  %v725_v58 = vsel %vm375_vm4, %v1963_v34, %v606_v56  ;;  %v724_v59 = vsel %vm374_vm6, %v1967_v35, %v605_v57  ;;  %v597_v60 = vsel %vm478_vm9, %v1941_v29, 0.0  ;;  %vm422_vm10 = vcmp.eq.s32.totalorder %v1879_v9, %v1935_v27  ;;  %v2189_v53 = vld [vmem:[%s1891_s10 + $0x40] ss:$8 sm:$0x1] }
  0x79   : >> { %vm792_vm11 = vcmask 523264   ;;  %821 = vmatpush1.msra.mxu0 %v733_v55  ;;  %v716_v61 = vsel %vm366_vm8, %v1963_v34, %v597_v60  ;;  %v2050_v62 = vrot.slane %v1927_v25, %v1901_v13  ;;  %v2054_v63 = vrot.slane %v1938_v28, %v1901_v13 }
  0x7a   : >> { %vm365_vm12 = vcmp.eq.s32.totalorder %v1861_v3, %v1931_v26  ;;  %822 = vmatprep.subr.mxu0 %v725_v58  ;;  %vm477_vm13 = vcmp.eq.s32.totalorder %v1861_v3, %v1960_v33  ;;  %v2066_v2 = vrot.slane %v1927_v25, %v1904_v14  ;;  %v2070_v11 = vrot.slane %v1912_v20, %v1904_v14 }
  0x7b   : >> { %823 = vmatpush1.msra.mxu0 %v724_v59  ;;  %vm534_vm14 = vcmp.eq.s32.totalorder %v1879_v9, %v2050_v62  ;;  %v596_v13 = vsel %vm477_vm13, %v1945_v30, 0.0  ;;  %v2078_v15 = vrot.slane %v1938_v28, %v1904_v14  ;;  %vm357_vm15 = vcmp.eq.s32.totalorder %v1847_v1, %v1924_v24 }
  0x7c   : >> { %824 = vmatprep.subr.mxu0 %v716_v61  ;;  %v653_v16 = vsel %vm534_vm14, %v1949_v31, 0.0  ;;  %v715_v18 = vsel %vm365_vm12, %v1967_v35, %v596_v13  ;;  %vm421_vm0 = vcmp.eq.s32.totalorder %v1879_v9, %v2062_v0  ;;  %vm533_vm1 = vcmp.eq.s32.totalorder %v1879_v9, %v2066_v2 }
  0x7d   : >> { %v772_v14 = vsel %vm422_vm10, %v2054_v63, %v653_v16  ;;  %825 = vmatpush1.msra.mxu0 %v715_v18  ;;  %v652_v19 = vsel %vm533_vm1, %v2070_v11, 0.0  ;;  %vm469_vm2 = vcmp.eq.s32.totalorder %v1847_v1, %v1954_v32  ;;  %vm413_vm3 = vcmp.eq.s32.totalorder %v1876_v8, %v1935_v27 }
  0x7e   : >> { %883 = vmatprep.subr.mxu1 %v772_v14  ;;  %v771_v36 = vsel %vm421_vm0, %v2078_v15, %v652_v19  ;;  %v588_v37 = vsel %vm469_vm2, %v1941_v29, 0.0  ;;  %vm525_vm4 = vcmp.eq.s32.totalorder %v1876_v8, %v2050_v62  ;;  %vm356_vm5 = vcmp.eq.s32.totalorder %v1847_v1, %v1931_v26  ;;  %v2116_v26 = vld [vmem:[%s781_s9] sm:$0xff] }
  0x7f   : >> { %884 = vmatpush1.msra.mxu1 %v771_v36  ;;  %v707_v32 = vsel %vm357_vm15, %v1963_v34, %v588_v37  ;;  %v644_v38 = vsel %vm525_vm4, %v1949_v31, 0.0  ;;  %vm468_vm6 = vcmp.eq.s32.totalorder %v1847_v1, %v1960_v33  ;;  %vm412_vm7 = vcmp.eq.s32.totalorder %v1876_v8, %v2062_v0 }
  0x80   : >> { %826 = vmatprep.subr.mxu0 %v707_v32  ;;  %v763_v29 = vsel %vm413_vm3, %v2054_v63, %v644_v38  ;;  %v587_v39 = vsel %vm468_vm6, %v1945_v30, 0.0  ;;  %vm524_vm8 = vcmp.eq.s32.totalorder %v1876_v8, %v2066_v2  ;;  %vm404_vm9 = vcmp.eq.s32.totalorder %v1873_v7, %v1935_v27 }
  0x81   : >> { %885 = vmatprep.subr.mxu1 %v763_v29  ;;  %v706_v24 = vsel %vm356_vm5, %v1967_v35, %v587_v39  ;;  %v643_v33 = vsel %vm524_vm8, %v2070_v11, 0.0  ;;  %vm516_vm10 = vcmp.eq.s32.totalorder %v1873_v7, %v2050_v62  ;;  %v2126_v30 = vrot.slane %v1908_v17, %v1915_v21 }
  0x82   : >> { %827 = vmatpush1.msra.mxu0 %v706_v24  ;;  %v762_v34 = vsel %vm412_vm7, %v2078_v15, %v643_v33  ;;  %v635_v40 = vsel %vm516_vm10, %v1949_v31, 0.0  ;;  %v2132_v41 = vrot.slane %v1927_v25, %v1915_v21  ;;  %v2136_v35 = vrot.slane %v1912_v20, %v1915_v21 }
  0x83   : >> { %886 = vmatpush1.msra.mxu1 %v762_v34  ;;  %1339 = vmatmul.mubr.msk.f32.vlgmr.msra.gmra.mxu0 %vm792_vm11, %v2116_v26  ;;  %v754_v42 = vsel %vm404_vm9, %v2054_v63, %v635_v40  ;;  %vm424_vm12 = vcmp.eq.s32.totalorder %v1879_v9, %v2126_v30  ;;  %v2145_v43 = vrot.slane %v1938_v28, %v1915_v21  ;;  %v2148_v44 = vsub.s32 6, %v1847_v1  ;;  %v2161_v21 = vld [vmem:[%s1894_s5 + $0x40] ss:$8 sm:$0x1] }
  0x84   : >> { %887 = vmatprep.subr.mxu1 %v754_v42  ;;  %vm536_vm13 = vcmp.eq.s32.totalorder %v1879_v9, %v2132_v41  ;;  %vm403_vm14 = vcmp.eq.s32.totalorder %v1873_v7, %v2062_v0  ;;  %vm515_vm15 = vcmp.eq.s32.totalorder %v1873_v7, %v2066_v2  ;;  %v2158_v45 = vrot.slane %v1908_v17, %v1918_v22 }
  0x85   : >> { %v655_v46 = vsel %vm536_vm13, %v2136_v35, 0.0  ;;  %v634_v47 = vsel %vm515_vm15, %v2070_v11, 0.0  ;;  %v2167_v48 = vrot.slane %v1927_v25, %v1918_v22  ;;  %v2171_v49 = vrot.slane %v1912_v20, %v1918_v22  ;;  %1002 = vmatprep.mubr.f32.mxu0 %v1665_v10 }
  0x86   : >> { %v774_v50 = vsel %vm424_vm12, %v2145_v43, %v655_v46  ;;  %v753_v51 = vsel %vm403_vm14, %v2078_v15, %v634_v47  ;;  %vm423_vm0 = vcmp.eq.s32.totalorder %v1879_v9, %v2158_v45  ;;  %v2180_v52 = vrot.slane %v1938_v28, %v1918_v22 }
  0x87   : >> { %954 = vmatprep.subr.mxu0 %v774_v50  ;;  %888 = vmatpush1.msra.mxu1 %v753_v51  ;;  %vm535_vm1 = vcmp.eq.s32.totalorder %v1879_v9, %v2167_v48  ;;  %vm395_vm2 = vcmp.eq.s32.totalorder %v1870_v6, %v1935_v27  ;;  %vm507_vm3 = vcmp.eq.s32.totalorder %v1870_v6, %v2050_v62  ;;  %v429_v54 = vsub.f32 1.0, %v2161_v21 }
  0x88   : >> { %v654_v55 = vsel %vm535_vm1, %v2171_v49, 0.0  ;;  %v626_v22 = vsel %vm507_vm3, %v1949_v31, 0.0  ;;  %vm415_vm4 = vcmp.eq.s32.totalorder %v1876_v8, %v2126_v30  ;;  %vm527_vm5 = vcmp.eq.s32.totalorder %v1876_v8, %v2132_v41 }
  0x89   : >> { %v773_v56 = vsel %vm423_vm0, %v2180_v52, %v654_v55  ;;  %v745_v57 = vsel %vm395_vm2, %v2054_v63, %v626_v22  ;;  %v646_v58 = vsel %vm527_vm5, %v2136_v35, 0.0  ;;  %vm394_vm6 = vcmp.eq.s32.totalorder %v1870_v6, %v2062_v0 }
  0x8a   : >> { %955 = vmatpush1.msra.mxu0 %v773_v56  ;;  %889 = vmatprep.subr.mxu1 %v745_v57  ;;  %v765_v59 = vsel %vm415_vm4, %v2145_v43, %v646_v58  ;;  %vm506_vm7 = vcmp.eq.s32.totalorder %v1870_v6, %v2066_v2  ;;  %vm414_vm8 = vcmp.eq.s32.totalorder %v1876_v8, %v2158_v45  ;;  %v2209_v60 = vadd.s32 1, %v2189_v53 }
  0x8b   : >> { %956 = vmatprep.subr.mxu0 %v765_v59  ;;  %v625_v61 = vsel %vm506_vm7, %v2070_v11, 0.0  ;;  %vm526_vm9 = vcmp.eq.s32.totalorder %v1876_v8, %v2167_v48  ;;  %vm386_vm10 = vcmp.eq.s32.totalorder %v1867_v5, %v1935_v27  ;;  %vm498_vm12 = vcmp.eq.s32.totalorder %v1867_v5, %v2050_v62 }
  0x8c   : >> { %v744_v13 = vsel %vm394_vm6, %v2078_v15, %v625_v61  ;;  %v645_v16 = vsel %vm526_vm9, %v2171_v49, 0.0  ;;  %v617_v18 = vsel %vm498_vm12, %v1949_v31, 0.0  ;;  %vm406_vm13 = vcmp.eq.s32.totalorder %v1873_v7, %v2126_v30 }
  0x8d   : >> { %890 = vmatpush1.msra.mxu1 %v744_v13  ;;  %v764_v14 = vsel %vm414_vm8, %v2180_v52, %v645_v16  ;;  %v736_v19 = vsel %vm386_vm10, %v2054_v63, %v617_v18  ;;  %vm518_vm14 = vcmp.eq.s32.totalorder %v1873_v7, %v2132_v41  ;;  %vm385_vm15 = vcmp.eq.s32.totalorder %v1867_v5, %v2062_v0 }
  0x8e   : >> { %957 = vmatpush1.msra.mxu0 %v764_v14  ;;  %891 = vmatprep.subr.mxu1 %v736_v19  ;;  %v637_v36 = vsel %vm518_vm14, %v2136_v35, 0.0  ;;  %vm497_vm0 = vcmp.eq.s32.totalorder %v1867_v5, %v2066_v2  ;;  %vm405_vm1 = vcmp.eq.s32.totalorder %v1873_v7, %v2158_v45  ;;  %vm517_vm2 = vcmp.eq.s32.totalorder %v1873_v7, %v2167_v48 }
  0x8f   : >> { %v756_v37 = vsel %vm406_vm13, %v2145_v43, %v637_v36  ;;  %v616_v32 = vsel %vm497_vm0, %v2070_v11, 0.0  ;;  %v636_v38 = vsel %vm517_vm2, %v2171_v49, 0.0  ;;  %vm377_vm3 = vcmp.eq.s32.totalorder %v1864_v4, %v1935_v27 }
  0x90   : >> { %958 = vmatprep.subr.mxu0 %v756_v37  ;;  %v735_v29 = vsel %vm385_vm15, %v2078_v15, %v616_v32  ;;  %v755_v39 = vsel %vm405_vm1, %v2180_v52, %v636_v38  ;;  %vm489_vm4 = vcmp.eq.s32.totalorder %v1864_v4, %v2050_v62  ;;  %vm397_vm5 = vcmp.eq.s32.totalorder %v1870_v6, %v2126_v30 }
  0x91   : >> { %892 = vmatpush1.msra.mxu1 %v735_v29  ;;  %959 = vmatpush1.msra.mxu0 %v755_v39  ;;  %v608_v24 = vsel %vm489_vm4, %v1949_v31, 0.0  ;;  %vm509_vm6 = vcmp.eq.s32.totalorder %v1870_v6, %v2132_v41  ;;  %vm376_vm7 = vcmp.eq.s32.totalorder %v1864_v4, %v2062_v0  ;;  %vm488_vm8 = vcmp.eq.s32.totalorder %v1864_v4, %v2066_v2 }
  0x92   : >> { %v727_v33 = vsel %vm377_vm3, %v2054_v63, %v608_v24  ;;  %v628_v34 = vsel %vm509_vm6, %v2136_v35, 0.0  ;;  %v607_v40 = vsel %vm488_vm8, %v2070_v11, 0.0  ;;  %vm396_vm9 = vcmp.eq.s32.totalorder %v1870_v6, %v2158_v45 }
  0x93   : >> { %893 = vmatprep.subr.mxu1 %v727_v33  ;;  %v747_v42 = vsel %vm397_vm5, %v2145_v43, %v628_v34  ;;  %v726_v46 = vsel %vm376_vm7, %v2078_v15, %v607_v40  ;;  %vm508_vm10 = vcmp.eq.s32.totalorder %v1870_v6, %v2167_v48  ;;  %vm368_vm12 = vcmp.eq.s32.totalorder %v1861_v3, %v1935_v27 }
  0x94   : >> { %960 = vmatprep.subr.mxu0 %v747_v42  ;;  %894 = vmatpush1.msra.mxu1 %v726_v46  ;;  %v627_v47 = vsel %vm508_vm10, %v2171_v49, 0.0  ;;  %vm480_vm13 = vcmp.eq.s32.totalorder %v1861_v3, %v2050_v62  ;;  %vm388_vm14 = vcmp.eq.s32.totalorder %v1867_v5, %v2126_v30  ;;  %vm500_vm15 = vcmp.eq.s32.totalorder %v1867_v5, %v2132_v41 }
  0x95   : >> { %v746_v50 = vsel %vm396_vm9, %v2180_v52, %v627_v47  ;;  %v599_v51 = vsel %vm480_vm13, %v1949_v31, 0.0  ;;  %v619_v55 = vsel %vm500_vm15, %v2136_v35, 0.0  ;;  %vm367_vm0 = vcmp.eq.s32.totalorder %v1861_v3, %v2062_v0 }
  0x96   : >> { %961 = vmatpush1.msra.mxu0 %v746_v50  ;;  %v718_v22 = vsel %vm368_vm12, %v2054_v63, %v599_v51  ;;  %v738_v56 = vsel %vm388_vm14, %v2145_v43, %v619_v55  ;;  %vm479_vm1 = vcmp.eq.s32.totalorder %v1861_v3, %v2066_v2  ;;  %vm387_vm2 = vcmp.eq.s32.totalorder %v1867_v5, %v2158_v45 }
  0x97   : >> { %895 = vmatprep.subr.mxu1 %v718_v22  ;;  %962 = vmatprep.subr.mxu0 %v738_v56  ;;  %v598_v57 = vsel %vm479_vm1, %v2070_v11, 0.0  ;;  %vm499_vm3 = vcmp.eq.s32.totalorder %v1867_v5, %v2167_v48  ;;  %vm359_vm4 = vcmp.eq.s32.totalorder %v1847_v1, %v1935_v27  ;;  %vm471_vm5 = vcmp.eq.s32.totalorder %v1847_v1, %v2050_v62 }
  0x98   : >> { %v717_v58 = vsel %vm367_vm0, %v2078_v15, %v598_v57  ;;  %v618_v59 = vsel %vm499_vm3, %v2171_v49, 0.0  ;;  %v590_v61 = vsel %vm471_vm5, %v1949_v31, 0.0  ;;  %vm379_vm6 = vcmp.eq.s32.totalorder %v1864_v4, %v2126_v30 }
  0x99   : >> { %896 = vmatpush1.msra.mxu1 %v717_v58  ;;  %v737_v13 = vsel %vm387_vm2, %v2180_v52, %v618_v59  ;;  %v709_v16 = vsel %vm359_vm4, %v2054_v63, %v590_v61  ;;  %vm491_vm7 = vcmp.eq.s32.totalorder %v1864_v4, %v2132_v41  ;;  %vm358_vm8 = vcmp.eq.s32.totalorder %v1847_v1, %v2062_v0 }
  0x9a   : >> { %963 = vmatpush1.msra.mxu0 %v737_v13  ;;  %897 = vmatprep.subr.mxu1 %v709_v16  ;;  %v610_v27 = vsel %vm491_vm7, %v2136_v35, 0.0  ;;  %vm470_vm9 = vcmp.eq.s32.totalorder %v1847_v1, %v2066_v2  ;;  %vm378_vm10 = vcmp.eq.s32.totalorder %v1864_v4, %v2158_v45  ;;  %vm490_vm12 = vcmp.eq.s32.totalorder %v1864_v4, %v2167_v48 }
  0x9b   : >> { %v729_v31 = vsel %vm379_vm6, %v2145_v43, %v610_v27  ;;  %v589_v62 = vsel %vm470_vm9, %v2070_v11, 0.0  ;;  %v609_v63 = vsel %vm490_vm12, %v2171_v49, 0.0  ;;  %vm370_vm13 = vcmp.eq.s32.totalorder %v1861_v3, %v2126_v30 }
  0x9c   : >> { %964 = vmatprep.subr.mxu0 %v729_v31  ;;  %v708_v0 = vsel %vm358_vm8, %v2078_v15, %v589_v62  ;;  %v728_v2 = vsel %vm378_vm10, %v2180_v52, %v609_v63  ;;  %vm482_vm14 = vcmp.eq.s32.totalorder %v1861_v3, %v2132_v41  ;;  %v2319_v18 = vrot.slane %v1908_v17, %v1921_v23 }
  0x9d   : >> { %898 = vmatpush1.msra.mxu1 %v708_v0  ;;  %965 = vmatpush1.msra.mxu0 %v728_v2  ;;  %v601_v11 = vsel %vm482_vm14, %v2136_v35, 0.0  ;;  %v2324_v14 = vrot.slane %v1927_v25, %v1921_v23  ;;  %v2328_v15 = vrot.slane %v1912_v20, %v1921_v23  ;;  %v2332_v19 = vrot.slane %v1938_v28, %v1921_v23 }
  0x9e   : >> { %v720_v36 = vsel %vm370_vm13, %v2145_v43, %v601_v11  ;;  %vm426_vm15 = vcmp.eq.s32.totalorder %v1879_v9, %v2319_v18  ;;  %1340 = vmatmul.mubr.msk.f32.vlgmr.msra.gmra.mxu1 %vm792_vm11, %v2116_v26  ;;  %vm369_vm0 = vcmp.eq.s32.totalorder %v1861_v3, %v2158_v45  ;;  %vm481_vm1 = vcmp.eq.s32.totalorder %v1861_v3, %v2167_v48 }
  0x9f   : >> { %966 = vmatprep.subr.mxu0 %v720_v36  ;;  %vm538_vm2 = vcmp.eq.s32.totalorder %v1879_v9, %v2324_v14  ;;  %v600_v23 = vsel %vm481_vm1, %v2171_v49, 0.0  ;;  %v2348_v37 = vrot.slane %v1908_v17, %v2148_v44  ;;  %v2352_v32 = vrot.slane %v1927_v25, %v2148_v44  ;;  %1073 = vmatprep.mubr.f32.mxu1 %v1665_v10 }
  0xa0   : >> { %v657_v38 = vsel %vm538_vm2, %v2328_v15, 0.0  ;;  %v719_v29 = vsel %vm369_vm0, %v2180_v52, %v600_v23  ;;  %v2359_v39 = vrot.slane %v1912_v20, %v2148_v44  ;;  %v2363_v24 = vrot.slane %v1938_v28, %v2148_v44 }
  0xa1   : >> { %v776_v17 = vsel %vm426_vm15, %v2332_v19, %v657_v38  ;;  %967 = vmatpush1.msra.mxu0 %v719_v29  ;;  %vm425_vm3 = vcmp.eq.s32.totalorder %v1879_v9, %v2348_v37  ;;  %vm537_vm4 = vcmp.eq.s32.totalorder %v1879_v9, %v2352_v32  ;;  %vm361_vm5 = vcmp.eq.s32.totalorder %v1847_v1, %v2126_v30 }
  0xa2   : >> { %1025 = vmatprep.subr.mxu1 %v776_v17  ;;  %v656_v20 = vsel %vm537_vm4, %v2359_v39, 0.0  ;;  %vm473_vm6 = vcmp.eq.s32.totalorder %v1847_v1, %v2132_v41  ;;  %vm417_vm7 = vcmp.eq.s32.totalorder %v1876_v8, %v2319_v18  ;;  %vm529_vm8 = vcmp.eq.s32.totalorder %v1876_v8, %v2324_v14 }
  0xa3   : >> { %v775_v25 = vsel %vm425_vm3, %v2363_v24, %v656_v20  ;;  %v592_v28 = vsel %vm473_vm6, %v2136_v35, 0.0  ;;  %v648_v44 = vsel %vm529_vm8, %v2328_v15, 0.0  ;;  %vm360_vm9 = vcmp.eq.s32.totalorder %v1847_v1, %v2158_v45  ;;  %v783_v20 = vld [vmem:[%s1849_s30] sm:$0xff] }
  0xa4   : >> { %1026 = vmatpush1.msra.mxu1 %v775_v25  ;;  %v711_v30 = vsel %vm361_vm5, %v2145_v43, %v592_v28  ;;  %v767_v41 = vsel %vm417_vm7, %v2332_v19, %v648_v44  ;;  %vm472_vm10 = vcmp.eq.s32.totalorder %v1847_v1, %v2167_v48  ;;  %vm416_vm12 = vcmp.eq.s32.totalorder %v1876_v8, %v2348_v37  ;;  %v784_v28 = vld [vmem:[%s1849_s30 + $0x8] sm:$0xff] }
  0xa5   : >> { %968 = vmatprep.subr.mxu0 %v711_v30  ;;  %1027 = vmatprep.subr.mxu1 %v767_v41  ;;  %v591_v35 = vsel %vm472_vm10, %v2171_v49, 0.0  ;;  %vm528_vm13 = vcmp.eq.s32.totalorder %v1876_v8, %v2352_v32  ;;  %vm408_vm14 = vcmp.eq.s32.totalorder %v1873_v7, %v2319_v18  ;;  %vm520_vm15 = vcmp.eq.s32.totalorder %v1873_v7, %v2324_v14 }
  0xa6   : >> { %v710_v43 = vsel %vm360_vm9, %v2180_v52, %v591_v35  ;;  %v647_v45 = vsel %vm528_vm13, %v2359_v39, 0.0  ;;  %v639_v48 = vsel %vm520_vm15, %v2328_v15, 0.0  ;;  %vm407_vm0 = vcmp.eq.s32.totalorder %v1873_v7, %v2348_v37  ;;  %v785_v35 = vld [vmem:[%s1849_s30 + $0x10] sm:$0xff] }
  0xa7   : >> { %969 = vmatpush1.msra.mxu0 %v710_v43  ;;  %v766_v49 = vsel %vm416_vm12, %v2363_v24, %v647_v45  ;;  %v758_v33 = vsel %vm408_vm14, %v2332_v19, %v639_v48  ;;  %vm519_vm1 = vcmp.eq.s32.totalorder %v1873_v7, %v2352_v32  ;;  %v2408_v34 = vrot.slane %v2189_v53, %v1898_v12  ;;  %v786_v43 = vld [vmem:[%s1849_s30 + $0x18] sm:$0xff] }
  0xa8   : >> { %1028 = vmatpush1.msra.mxu1 %v766_v49  ;;  %1341 = vmatmul.mubr.msk.f32.vlgmr.msra.gmra.mxu0 %vm792_vm11, %v2116_v26  ;;  %v638_v52 = vsel %vm519_vm1, %v2359_v39, 0.0  ;;  %v2415_v40 = vrot.slane %v2209_v60, %v1898_v12  ;;  %v2419_v42 = vrot.slane %v2161_v21, %v1898_v12  ;;  %v2424_v46 = vrot.slane %v429_v54, %v1898_v12  ;;  %v787_v49 = vld [vmem:[%s1849_s30 + $0x20] sm:$0xff] }
  0xa9   : >> { %1029 = vmatprep.subr.mxu1 %v758_v33  ;;  %1359 = vmatprep.subr.mxu0 %v1665_v10  ;;  %v757_v53 = vsel %vm407_vm0, %v2363_v24, %v638_v52  ;;  %vm427_vm2 = vcmp.eq.s32.totalorder %v1879_v9, %v2408_v34  ;;  %vm399_vm3 = vcmp.eq.s32.totalorder %v1870_v6, %v2319_v18  ;;  %vm1666_vm9 = vmmov 0  }
  0xaa   : >> { %1030 = vmatpush1.msra.mxu1 %v757_v53  ;;  %vm539_vm4 = vcmp.eq.s32.totalorder %v1879_v9, %v2415_v40  ;;  %vm511_vm5 = vcmp.eq.s32.totalorder %v1870_v6, %v2324_v14  ;;  %vm398_vm6 = vcmp.eq.s32.totalorder %v1870_v6, %v2348_v37  ;;  %vm510_vm7 = vcmp.eq.s32.totalorder %v1870_v6, %v2352_v32 }
  0xab   : >> { %v658_v12 = vsel %vm539_vm4, %v2419_v42, 0.0  ;;  %v630_v21 = vsel %vm511_vm5, %v2328_v15, 0.0  ;;  %v629_v54 = vsel %vm510_vm7, %v2359_v39, 0.0  ;;  %vm418_vm8 = vcmp.eq.s32.totalorder %v1876_v8, %v2408_v34  ;;  %1375 = vmatprep.mubr.msk.f32.mxu0 %vm1666_vm9, %v1665_v10 }
  0xac   : >> { %v777_v60 = vsel %vm427_vm2, %v2424_v46, %v658_v12  ;;  %v749_v47 = vsel %vm399_vm3, %v2332_v19, %v630_v21  ;;  %v748_v50 = vsel %vm398_vm6, %v2363_v24, %v629_v54  ;;  %vm530_vm10 = vcmp.eq.s32.totalorder %v1876_v8, %v2415_v40  ;;  %v790_v12 = vld [vmem:[%s1849_s30 + $0x38] sm:$0xff] }
  0xad   : >> { %1360 = vmatpush3.msra.mxu0 %v777_v60  ;;  %1031 = vmatprep.subr.mxu1 %v749_v47  ;;  %v649_v51 = vsel %vm530_vm10, %v2419_v42, 0.0  ;;  %vm390_vm12 = vcmp.eq.s32.totalorder %v1867_v5, %v2319_v18  ;;  %vm502_vm13 = vcmp.eq.s32.totalorder %v1867_v5, %v2324_v14  ;;  %vm389_vm14 = vcmp.eq.s32.totalorder %v1867_v5, %v2348_v37  ;;  %v791_v47 = vld [vmem:[%s1849_s30 + $0x40] sm:$0xff] }
  0xae   : >> { %1361 = vmatprep.subr.mxu0 %v1665_v10  ;;  %1032 = vmatpush1.msra.mxu1 %v748_v50  ;;  %v768_v55 = vsel %vm418_vm8, %v2424_v46, %v649_v51  ;;  %v621_v22 = vsel %vm502_vm13, %v2328_v15, 0.0  ;;  %vm501_vm15 = vcmp.eq.s32.totalorder %v1867_v5, %v2352_v32  ;;  %vm409_vm0 = vcmp.eq.s32.totalorder %v1873_v7, %v2408_v34 }
  0xaf   : >> { %1362 = vmatpush3.msra.mxu0 %v768_v55  ;;  %v740_v56 = vsel %vm390_vm12, %v2332_v19, %v621_v22  ;;  %v620_v57 = vsel %vm501_vm15, %v2359_v39, 0.0  ;;  %vm521_vm1 = vcmp.eq.s32.totalorder %v1873_v7, %v2415_v40  ;;  %vm381_vm2 = vcmp.eq.s32.totalorder %v1864_v4, %v2319_v18 }
  0xb0   : >> { %1033 = vmatprep.subr.mxu1 %v740_v56  ;;  %1363 = vmatprep.subr.mxu0 %v1665_v10  ;;  %v739_v58 = vsel %vm389_vm14, %v2363_v24, %v620_v57  ;;  %v640_v59 = vsel %vm521_vm1, %v2419_v42, 0.0  ;;  %vm493_vm3 = vcmp.eq.s32.totalorder %v1864_v4, %v2324_v14  ;;  %vm380_vm4 = vcmp.eq.s32.totalorder %v1864_v4, %v2348_v37 }
  0xb1   : >> { %1034 = vmatpush1.msra.mxu1 %v739_v58  ;;  %v759_v61 = vsel %vm409_vm0, %v2424_v46, %v640_v59  ;;  %v612_v13 = vsel %vm493_vm3, %v2328_v15, 0.0  ;;  %vm492_vm5 = vcmp.eq.s32.totalorder %v1864_v4, %v2352_v32  ;;  %vm400_vm6 = vcmp.eq.s32.totalorder %v1870_v6, %v2408_v34 }
  0xb2   : >> { %1364 = vmatpush3.msra.mxu0 %v759_v61  ;;  %v731_v16 = vsel %vm381_vm2, %v2332_v19, %v612_v13  ;;  %v611_v27 = vsel %vm492_vm5, %v2359_v39, 0.0  ;;  %vm512_vm7 = vcmp.eq.s32.totalorder %v1870_v6, %v2415_v40  ;;  %vm372_vm8 = vcmp.eq.s32.totalorder %v1861_v3, %v2319_v18 }
  0xb3   : >> { %1035 = vmatprep.subr.mxu1 %v731_v16  ;;  %1365 = vmatprep.subr.mxu0 %v1665_v10  ;;  %v730_v31 = vsel %vm380_vm4, %v2363_v24, %v611_v27  ;;  %v631_v62 = vsel %vm512_vm7, %v2419_v42, 0.0  ;;  %vm484_vm9 = vcmp.eq.s32.totalorder %v1861_v3, %v2324_v14  ;;  %vm371_vm10 = vcmp.eq.s32.totalorder %v1861_v3, %v2348_v37 }
  0xb4   : >> { %1036 = vmatpush1.msra.mxu1 %v730_v31  ;;  %v750_v63 = vsel %vm400_vm6, %v2424_v46, %v631_v62  ;;  %v603_v0 = vsel %vm484_vm9, %v2328_v15, 0.0  ;;  %vm483_vm12 = vcmp.eq.s32.totalorder %v1861_v3, %v2352_v32  ;;  %vm391_vm13 = vcmp.eq.s32.totalorder %v1867_v5, %v2408_v34 }
  0xb5   : >> { %1366 = vmatpush3.msra.mxu0 %v750_v63  ;;  %v722_v2 = vsel %vm372_vm8, %v2332_v19, %v603_v0  ;;  %v602_v11 = vsel %vm483_vm12, %v2359_v39, 0.0  ;;  %vm503_vm14 = vcmp.eq.s32.totalorder %v1867_v5, %v2415_v40  ;;  %vm363_vm15 = vcmp.eq.s32.totalorder %v1847_v1, %v2319_v18 }
  0xb6   : >> { %1037 = vmatprep.subr.mxu1 %v722_v2  ;;  %1367 = vmatprep.subr.mxu0 %v1665_v10  ;;  %v721_v36 = vsel %vm371_vm10, %v2363_v24, %v602_v11  ;;  %v622_v23 = vsel %vm503_vm14, %v2419_v42, 0.0  ;;  %vm475_vm0 = vcmp.eq.s32.totalorder %v1847_v1, %v2324_v14  ;;  %vm362_vm1 = vcmp.eq.s32.totalorder %v1847_v1, %v2348_v37 }
  0xb7   : >> { %1038 = vmatpush1.msra.mxu1 %v721_v36  ;;  %v741_v38 = vsel %vm391_vm13, %v2424_v46, %v622_v23  ;;  %v594_v29 = vsel %vm475_vm0, %v2328_v15, 0.0  ;;  %vm474_vm2 = vcmp.eq.s32.totalorder %v1847_v1, %v2352_v32  ;;  %vm382_vm3 = vcmp.eq.s32.totalorder %v1864_v4, %v2408_v34 }
  0xb8   : >> { %1368 = vmatpush3.msra.mxu0 %v741_v38  ;;  %v713_v18 = vsel %vm363_vm15, %v2332_v19, %v594_v29  ;;  %v593_v17 = vsel %vm474_vm2, %v2359_v39, 0.0  ;;  %vm494_vm4 = vcmp.eq.s32.totalorder %v1864_v4, %v2415_v40  ;;  %vm373_vm5 = vcmp.eq.s32.totalorder %v1861_v3, %v2408_v34 }
  0xb9   : >> { %1039 = vmatprep.subr.mxu1 %v713_v18  ;;  %1369 = vmatprep.subr.mxu0 %v1665_v10  ;;  %v712_v14 = vsel %vm362_vm1, %v2363_v24, %v593_v17  ;;  %v613_v15 = vsel %vm494_vm4, %v2419_v42, 0.0  ;;  %vm485_vm6 = vcmp.eq.s32.totalorder %v1861_v3, %v2415_v40  ;;  %vm364_vm7 = vcmp.eq.s32.totalorder %v1847_v1, %v2408_v34  ;;  %v788_v34 = vld [vmem:[%s1849_s30 + $0x28] sm:$0xff] }
  0xba   : >> { %1040 = vmatpush1.msra.mxu1 %v712_v14  ;;  %v732_v19 = vsel %vm382_vm3, %v2424_v46, %v613_v15  ;;  %v604_v37 = vsel %vm485_vm6, %v2419_v42, 0.0  ;;  %vm476_vm8 = vcmp.eq.s32.totalorder %v1847_v1, %v2415_v40 }
  0xbb   : >> { %1370 = vmatpush3.msra.mxu0 %v732_v19  ;;  %1342 = vmatmul.mubr.msk.f32.vlgmr.msra.gmra.mxu1 %vm792_vm11, %v2116_v26  ;;  %v723_v32 = vsel %vm373_vm5, %v2424_v46, %v604_v37  ;;  %v595_v39 = vsel %vm476_vm8, %v2419_v42, 0.0 }
  0xbc   : >> { %1371 = vmatprep.subr.mxu0 %v1665_v10  ;;  %v714_v24 = vsel %vm364_vm7, %v2424_v46, %v595_v39  ;;  %v789_v46 = vld [vmem:[%s1849_s30 + $0x30] sm:$0xff] }
  0xbd   : >> { %1372 = vmatpush3.msra.mxu0 %v723_v32 }
  0xbe   : >> { %1373 = vmatprep.subr.mxu0 %v1665_v10 }
  0xbf   : >> { %1374 = vmatpush3.msra.mxu0 %v714_v24 }
  0xc0   : >> { %1376 = vmatmul.mubr.msk.f32.vlgmr.msra.gmra.mxu0 %vm792_vm11, %v2116_v26 }
 0x143   : >> { %v862_v25 = vpop.f32.mrf.mxu0 }
 0x144   : >> { %v1150_v44 = vadd.f32 %v862_v25, %v783_v20 }
 0x145   : >> { %v864_v30 = vpop.f32.mrf.mxu0 }
 0x146   : >> { %1159 = vst [vmem:[%s1849_s30] sm:$0xff] %v1150_v44  ;;  %v1151_v41 = vadd.f32 %v864_v30, %v784_v28 }
 0x148   : >> { %1160 = vst [vmem:[%s1849_s30 + $0x8] sm:$0xff] %v1151_v41 }
 0x15e   : >> { %v933_v10 = vpop.f32.mrf.mxu1 }
 0x15f   : >> { %v1152_v45 = vadd.f32 %v933_v10, %v785_v35 }
 0x160   : >> { %v935_v26 = vpop.f32.mrf.mxu1 }
 0x161   : >> { %1161 = vst [vmem:[%s1849_s30 + $0x10] sm:$0xff] %v1152_v45  ;;  %v1153_v48 = vadd.f32 %v935_v26, %v786_v43 }
 0x163   : >> { %1162 = vst [vmem:[%s1849_s30 + $0x18] sm:$0xff] %v1153_v48 }
 0x168   : >> { %v1004_v33 = vpop.f32.mrf.mxu0 }
 0x169   : >> { %v1154_v52 = vadd.f32 %v1004_v33, %v787_v49 }
 0x16a   : >> { %v1006_v40 = vpop.f32.mrf.mxu0 }
 0x16b   : >> { %1163 = vst [vmem:[%s1849_s30 + $0x20] sm:$0xff] %v1154_v52  ;;  %v1155_v42 = vadd.f32 %v1006_v40, %v788_v34 }
 0x16d   : >> { %1164 = vst [vmem:[%s1849_s30 + $0x28] sm:$0xff] %v1155_v42 }
 0x17b   : >> { %v1075_v53 = vpop.f32.mrf.mxu1 }
 0x17c   : >> { %v1156_v21 = vadd.f32 %v1075_v53, %v789_v46 }
 0x17d   : >> { %v1077_v54 = vpop.f32.mrf.mxu1 }
 0x17e   : >> { %1165 = vst [vmem:[%s1849_s30 + $0x30] sm:$0xff] %v1156_v21  ;;  %v1157_v60 = vadd.f32 %v1077_v54, %v790_v12 }
 0x17f   : > { %296 = sbr.rel (!%p294_p0) target bundleno = 95 (0x5f), region = 110 }
 0x180   : >> { %1166 = vst [vmem:[%s1849_s30 + $0x38] sm:$0xff] %v1157_v60  ;;  %v1146_v50 = vpop.f32.mrf.mxu0 }
 0x181   : >> { %v1158_v51 = vadd.f32 %v1146_v50, %v791_v47 }
 0x182   : >> { %v1377_v55 = vpop.f32.mrf.mxu0 }
 0x183   : >> { %1167 = vst [vmem:[%s1849_s30 + $0x40] sm:$0xff] %v1158_v51 }
 0x184   : > { %1571 = shalt.err (!%p1568_p7)
}
 0x185   : > { %s1572_s15 = scalar_lea.hbm %s1181_s11, 1152  ;;  %s1576_s30 = scalar_lea.hbm %s2613_s3, 2304 }
 0x186   : > { %p1573_p8 = scmp.ne.s32.totalorder %s1181_s11, %s1572_s15  ;;  %p1577_p12 = scmp.lt.s32.totalorder %s1181_s11, %s2613_s3 }
 0x187   : > { %p1578_p2 = scmp.lt.s32.totalorder %s1576_s30, %s1572_s15 }
 0x188   : > { %p1574_p9 = pnand %p1573_p8, %p2638_p4 }
 0x189   : > { %p1579_p0 = por %p1578_p2, %p1577_p12 }
 0x18a   : > { %p1575_p5 = pneg %p1574_p9 }
 0x18c   : > { %p1580_p1 = pnand %p1579_p0, %p1575_p5 }
 0x18e   : > { %1583 = shalt.err (!%p1580_p1)
}
 0x18f   : > { %1390 = dma.vmem_to_hbm [thread:$0]  (%p2638_p4), %s1184_s7, 1152, %s1181_s11, %s1169_s21  }
 0x190 PF: > { %s1195_s6 = sand.u32 1, %s1630_s12   ;;  %p2639_p6 = scmp.ne.s32.totalorder %s2625_s24, 0 }
 0x191   : > { %p2640_p10 = scmp.ge.s32.totalorder %s1650_s17, 2  ;;  %s1196_s4 = scalar_lea.sflag [#allocation4], %s1195_s6 }
 0x193   : > { %p1404_p11 = pnand %p2640_p10, %p2639_p6 }
 0x195   : > { %p1405_p13 = pneg %p1404_p11 }
 0x197   : > { %1625 = dma.done.wait (%p1405_p13), %s1196_s4, 1152  }
 0x198   : > { %1627 = vsyncadd (%p1405_p13), %s1196_s4, 4294966144  ;;  %s22_s17 = sadd.s32 1, %s1650_s17   ;;  %s2641_s20 = sld [smem:[#allocation13_spill]] }
 0x199   : > { %p19_p3 = scmp.ge.s32.totalorder %s22_s17, 4   ;;  %s2642_s14 = sld [smem:[#allocation15_spill]] }
 0x19a   : > { %s2643_s23 = sld [smem:[#allocation14_spill]]  ;;  %s2644_s12 = smov %s1634_s13 }
 0x19b   : > { %s2646_s15 = smov %s1646_s16 }
 0x19c   :  { %21 = sbr.rel (!%p19_p3) target bundleno = 11 (0xb), region = 121 }
 0x19e   : > { %s2645_s13 = smov %s2641_s20 }
 0x1a0   : > { %s2647_s16 = smov %s2643_s23 }
 0x1a1   :  { %1201 = vsyncpa [#allocation3], 1 }
 0x1a2   :  { %1203 = vsyncpa [#allocation3 + $0x1], 1 }
 0x1a3   :  { %1204 = vsyncpa [#allocation6], 1 }
 0x1a4   :  { %1206 = vsyncpa [#allocation6 + $0x1], 1 }
 0x1a5   :  { %1207 = vsyncpa [#allocation4], 1 }
 0x1a6   :  { %1209 = vsyncpa [#allocation4 + $0x1], 1 }

</bundles_post_ra>
